<compile_context>
chip_gen: v6e
topology: v6e:2x2x1
jax: 0.10.0
libtpu: 0.0.40
codegen_flags: <defaults>
</compile_context>

<pallas_src>
import jax
import jax.numpy as jnp
from jax.experimental import pallas as pl
from jax.experimental.pallas import tpu as pltpu

LN_EPS = 1e-5            # torch.nn.LayerNorm default eps
TILE_B_MAX = 2048        # batch rows per grid step (< 3 MiB VMEM even at 2048)
VMEM_LIMIT_BYTES = 32 * 1024 * 1024   # explicit scoped-VMEM limit (safe on v5e/v6e/v7x)


def _round_up(n, m):
    return ((n + m - 1) // m) * m


def _layernorm_noaffine(h):
    """LayerNorm (no affine) over the last axis, single-pass moments.

    Matches nn.LayerNorm statistics (biased variance, eps=1e-5); the affine
    gamma/beta have been folded into the following Linear by prepare_actor_params.
    """
    n = h.shape[-1]
    inv_n = 1.0 / n
    s1 = jnp.sum(h, axis=-1, keepdims=True)
    s2 = jnp.sum(h * h, axis=-1, keepdims=True)
    mu = s1 * inv_n
    var = jnp.maximum(s2 * inv_n - mu * mu, 0.0)
    return (h - mu) * jax.lax.rsqrt(var + LN_EPS)


def actor_kernel(
    x_ref,                 # (TB, D)        observation tile
    w0_ref, b0_ref,        # (D, H), (1, H) fc layer 0 (feature-norm affine folded in)
    w1_ref, b1_ref,        # (H, H), (1, H) fc layer 1 (LN0 affine folded in)
    wo_ref, bo_ref,        # (H, A_pad), (1, A_pad) output head (LN1 affine folded, lane-padded)
    logits_ref,            # (TB, A_pad)    output tile (lane-dense store)
):
    x = x_ref[...].astype(jnp.float32)

    # feature normalization (affine folded into w0/b0)
    x = _layernorm_noaffine(x)

    # fc layer 0: Linear -> ReLU -> LayerNorm (affine folded into w1/b1)
    h = jnp.dot(x, w0_ref[...], preferred_element_type=jnp.float32) + b0_ref[...]
    h = jnp.maximum(h, 0.0)
    h = _layernorm_noaffine(h)

    # fc layer 1: Linear -> ReLU -> LayerNorm (affine folded into wo/bo)
    h = jnp.dot(h, w1_ref[...], preferred_element_type=jnp.float32) + b1_ref[...]
    h = jnp.maximum(h, 0.0)
    h = _layernorm_noaffine(h)

    # output head (full 128-lane store; padded columns are exact zeros)
    logits_ref[...] = (
        jnp.dot(h, wo_ref[...], preferred_element_type=jnp.float32) + bo_ref[...]
    )


# ---------------- one-time parameter preparation (hoisted out of the call path) ----------------

def prepare_actor_params(p, lane_pad=128):
    """Fold every LayerNorm affine into the following Linear and pad the output head.

    Done ONCE per parameter set — never in the per-call path.
    """
    obs_dim, H = p["w0"].shape
    A = p["wo"].shape[1]
    A_pad = _round_up(max(A, lane_pad), lane_pad)

    w0f = p["fn_g"].reshape(-1, 1) * p["w0"]            # diag(fn_g) @ W0
    b0f = p["fn_b"] @ p["w0"] + p["b0"]                  # fn_b @ W0 + b0
    w1f = p["g0"].reshape(-1, 1) * p["w1"]               # diag(g0) @ W1
    b1f = p["be0"] @ p["w1"] + p["b1"]                   # be0 @ W1 + b1
    wof = p["g1"].reshape(-1, 1) * p["wo"]               # diag(g1) @ Wo
    bof = p["be1"] @ p["wo"] + p["bo"]                   # be1 @ Wo + bo

    wof = jnp.pad(wof, ((0, 0), (0, A_pad - A)))
    bof = jnp.pad(bof, ((0, 0), (0, A_pad - A)))

    return {
        "w0": w0f, "b0": b0f,
        "w1": w1f, "b1": b1f,
        "wo": wof, "bo": bof,
        "obs_dim": obs_dim, "hidden": H,
        "action_dim": A, "action_pad": A_pad,
    }


def actor_forward(x, fp, tile_b=None):
    """Batch-tiled pallas_call wrapper.

    x:  (B, obs_dim) float32 observations
    fp: dict from prepare_actor_params (folded + padded weights)
    Returns (logits (B, action_dim) float32, None) — matches Actor.forward with use_rnn=False.
    """
    B, obs_dim = x.shape
    assert obs_dim == fp["obs_dim"]
    H = fp["hidden"]
    A = fp["action_dim"]
    A_pad = fp["action_pad"]

    # batch tile: multiple of 8 sublanes; default aims for >=2 grid steps when B >= 16
    # so both TensorCores get work on v7x, capped at TILE_B_MAX.
    if tile_b is None:
        half = _round_up(max(pl.cdiv(B, 2), 8), 8)
        tile_b = min(TILE_B_MAX, half)
    tile_b = max(8, _round_up(tile_b, 8))
    B_pad = _round_up(B, tile_b)

    x_p = x if B_pad == B else jnp.pad(x, ((0, B_pad - B), (0, 0)))

    args = (x_p, fp["w0"], fp["b0"], fp["w1"], fp["b1"], fp["wo"], fp["bo"])

    batch_map = lambda i: (i, 0)   # streamed along the batch grid
    const_map = lambda i: (0, 0)   # weights: VMEM-resident (no re-DMA across steps)

    in_specs = [
        pl.BlockSpec((tile_b, obs_dim), batch_map),   # x
        pl.BlockSpec((obs_dim, H), const_map),        # w0 (folded)
        pl.BlockSpec((1, H), const_map),              # b0 (folded)
        pl.BlockSpec((H, H), const_map),              # w1 (folded)
        pl.BlockSpec((1, H), const_map),              # b1 (folded)
        pl.BlockSpec((H, A_pad), const_map),          # wo (folded + padded)
        pl.BlockSpec((1, A_pad), const_map),          # bo (folded + padded)
    ]
    out_specs = pl.BlockSpec((tile_b, A_pad), batch_map)

    grid = (B_pad // tile_b,)

    flops = 2 * B_pad * (obs_dim * H + H * H + H * A_pad)
    transcendentals = 3 * B_pad                           # three rsqrt per row
    bytes_accessed = 4 * (
        B_pad * (obs_dim + A_pad)                         # streamed activations
        + obs_dim * H + H * H + H * A_pad                 # weights
        + 2 * H + A_pad                                   # biases
    )
    cost = pl.CostEstimate(flops=flops, transcendentals=transcendentals,
                           bytes_accessed=bytes_accessed)

    logits_pad = pl.pallas_call(
        actor_kernel,
        grid=grid,
        out_shape=jax.ShapeDtypeStruct((B_pad, A_pad), jnp.float32),
        in_specs=in_specs,
        out_specs=out_specs,
        compiler_params=pltpu.CompilerParams(
            dimension_semantics=(pltpu.PARALLEL,),
            vmem_limit_bytes=VMEM_LIMIT_BYTES,
        ),
        cost_estimate=cost,
    )(*args)

    # Strip batch padding and lane padding. Padded columns are zeros (not -inf) and
    # padded rows are garbage — they MUST NOT reach downstream sampling, so slice here.
    logits = logits_pad[:B, :A]
    # rnn_states_out is None when use_rnn=False
    return logits, None


# ---------------- deterministic parameter init (mirrors the module __init__) ----------------

def _orthogonal(key, shape, gain):
    """Orthogonal init (deterministic given key), analogous to nn.init.orthogonal_."""
    # NOTE: built directly as (in_dim, out_dim); for non-square layers this is not the
    # exact transpose of PyTorch's (out,in) orthogonal_ — synthetic parity only.
    return jax.nn.initializers.orthogonal(scale=gain)(key, shape, jnp.float32)


def make_params(obs_dim, hidden, action_dim, actor_gain=0.01, seed=0):
    relu_gain = jnp.sqrt(2.0)  # nn.init.calculate_gain('relu')
    keys = jax.random.split(jax.random.PRNGKey(seed), 3)
    return {
        "fn_g": jnp.ones((1, obs_dim), jnp.float32),
        "fn_b": jnp.zeros((1, obs_dim), jnp.float32),
        "w0": _orthogonal(keys[0], (obs_dim, hidden), relu_gain),
        "b0": jnp.zeros((1, hidden), jnp.float32),
        "g0": jnp.ones((1, hidden), jnp.float32),
        "be0": jnp.zeros((1, hidden), jnp.float32),
        "w1": _orthogonal(keys[1], (hidden, hidden), relu_gain),
        "b1": jnp.zeros((1, hidden), jnp.float32),
        "g1": jnp.ones((1, hidden), jnp.float32),
        "be1": jnp.zeros((1, hidden), jnp.float32),
        "wo": _orthogonal(keys[2], (hidden, action_dim), actor_gain),
        "bo": jnp.zeros((1, action_dim), jnp.float32),
    }


def _layernorm_ref(h, gamma, beta):
    mu = jnp.mean(h, axis=-1, keepdims=True)
    var = jnp.mean(jnp.square(h - mu), axis=-1, keepdims=True)
    return (h - mu) * jax.lax.rsqrt(var + LN_EPS) * gamma + beta


def actor_forward_ref(x, params):
    """Pure-JAX reference (un-folded params) for correctness checking."""
    h = _layernorm_ref(x, params["fn_g"], params["fn_b"])
    h = jnp.maximum(h @ params["w0"] + params["b0"], 0.0)
    h = _layernorm_ref(h, params["g0"], params["be0"])
    h = jnp.maximum(h @ params["w1"] + params["b1"], 0.0)
    h = _layernorm_ref(h, params["g1"], params["be1"])
    return h @ params["wo"] + params["bo"]


if __name__ == "__main__":
    # small shapes consistent with the module: batch = n_agents * n_rollout_threads
    OBS_DIM, HIDDEN, ACTION_DIM = 16, 32, 6
    raw_params = make_params(OBS_DIM, HIDDEN, ACTION_DIM, actor_gain=0.01, seed=0)
    folded_params = prepare_actor_params(raw_params)   # one-time prep, hoisted off call path

    # (1) tiny batch, single grid step
    B = 8
    x = jax.random.normal(jax.random.PRNGKey(0), (B, OBS_DIM), jnp.float32)
    logits, rnn_states_out = actor_forward(x, folded_params)
    logits = jax.block_until_ready(logits)
    ref = actor_forward_ref(x, raw_params)
    assert logits.shape == (B, ACTION_DIM)
    assert rnn_states_out is None
    assert jnp.allclose(logits, ref, atol=1e-4, rtol=1e-4), "mismatch vs JAX reference (B=8)"

    # (2) ragged batch, multi-step grid + batch padding path (B not a multiple of tile)
    B2 = 300
    x2 = jax.random.normal(jax.random.PRNGKey(1), (B2, OBS_DIM), jnp.float32)
    logits2, _ = actor_forward(x2, folded_params, tile_b=128)
    logits2 = jax.block_until_ready(logits2)
    ref2 = actor_forward_ref(x2, raw_params)
    assert logits2.shape == (B2, ACTION_DIM)
    assert jnp.allclose(logits2, ref2, atol=1e-4, rtol=1e-4), "mismatch vs JAX reference (B=300)"

    print("KERNEL_OK")
</pallas_src>

<mosaic_0001>
module attributes {stable_mosaic.version = 11 : i64} {
  func.func @actor_kernel(%arg0: i32, %arg1: memref<8x16xf32, #tpu.memory_space<vmem>>, %arg2: memref<16x32xf32, #tpu.memory_space<vmem>>, %arg3: memref<1x32xf32, #tpu.memory_space<vmem>>, %arg4: memref<32x32xf32, #tpu.memory_space<vmem>>, %arg5: memref<1x32xf32, #tpu.memory_space<vmem>>, %arg6: memref<32x128xf32, #tpu.memory_space<vmem>>, %arg7: memref<1x128xf32, #tpu.memory_space<vmem>>, %arg8: memref<8x128xf32, #tpu.memory_space<vmem>>) attributes {dimension_semantics = [#tpu.dimension_semantics<parallel>], iteration_bounds = array<i64: 1>, scalar_prefetch = 0 : i64, scratch_operands = 0 : i64, tpu.core_type = #tpu.core_type<tc>, window_params = [{transform_indices = @transform_0, window_bounds = array<i64: 8, 16>}, {pipeline_mode = #tpu.pipeline_mode<synchronous>, transform_indices = @transform_1, window_bounds = array<i64: 16, 32>}, {pipeline_mode = #tpu.pipeline_mode<synchronous>, transform_indices = @transform_2, window_bounds = array<i64: 1, 32>}, {pipeline_mode = #tpu.pipeline_mode<synchronous>, transform_indices = @transform_3, window_bounds = array<i64: 32, 32>}, {pipeline_mode = #tpu.pipeline_mode<synchronous>, transform_indices = @transform_4, window_bounds = array<i64: 1, 32>}, {pipeline_mode = #tpu.pipeline_mode<synchronous>, transform_indices = @transform_5, window_bounds = array<i64: 32, 128>}, {pipeline_mode = #tpu.pipeline_mode<synchronous>, transform_indices = @transform_6, window_bounds = array<i64: 1, 128>}, {transform_indices = @transform_7, window_bounds = array<i64: 8, 128>}]} {
    %c0 = arith.constant 0 : index
    %c0_0 = arith.constant 0 : index
    %0 = vector.load %arg1[%c0, %c0_0] : memref<8x16xf32, #tpu.memory_space<vmem>>, vector<8x16xf32>
    %cst = arith.constant dense<0.000000e+00> : vector<8xf32>
    %1 = vector.multi_reduction <add>, %0, %cst [1] : vector<8x16xf32> to vector<8xf32>
    %2 = vector.shape_cast %1 : vector<8xf32> to vector<8x1xf32>
    %3 = arith.mulf %0, %0 : vector<8x16xf32>
    %cst_1 = arith.constant dense<0.000000e+00> : vector<8xf32>
    %4 = vector.multi_reduction <add>, %3, %cst_1 [1] : vector<8x16xf32> to vector<8xf32>
    %5 = vector.shape_cast %4 : vector<8xf32> to vector<8x1xf32>
    %cst_2 = arith.constant 6.250000e-02 : f32
    %6 = vector.broadcast %cst_2 : f32 to vector<8x1xf32>
    %7 = arith.mulf %2, %6 : vector<8x1xf32>
    %cst_3 = arith.constant 6.250000e-02 : f32
    %8 = vector.broadcast %cst_3 : f32 to vector<8x1xf32>
    %9 = arith.mulf %5, %8 : vector<8x1xf32>
    %10 = arith.mulf %7, %7 : vector<8x1xf32>
    %11 = arith.subf %9, %10 : vector<8x1xf32>
    %cst_4 = arith.constant 0.000000e+00 : f32
    %12 = vector.broadcast %cst_4 : f32 to vector<8x1xf32>
    %13 = arith.maximumf %11, %12 : vector<8x1xf32>
    %14 = vector.broadcast %7 : vector<8x1xf32> to vector<8x16xf32>
    %15 = arith.subf %0, %14 : vector<8x16xf32>
    %cst_5 = arith.constant 9.99999974E-6 : f32
    %16 = vector.broadcast %cst_5 : f32 to vector<8x1xf32>
    %17 = arith.addf %13, %16 : vector<8x1xf32>
    %18 = math.rsqrt %17 : vector<8x1xf32>
    %19 = vector.broadcast %18 : vector<8x1xf32> to vector<8x16xf32>
    %20 = arith.mulf %15, %19 : vector<8x16xf32>
    %c0_6 = arith.constant 0 : index
    %c0_7 = arith.constant 0 : index
    %21 = vector.load %arg2[%c0_6, %c0_7] : memref<16x32xf32, #tpu.memory_space<vmem>>, vector<16x32xf32>
    %cst_8 = arith.constant dense<0.000000e+00> : vector<8x32xf32>
    %22 = tpu.matmul %20, %21, %cst_8 {dimension_numbers = #tpu.dot_dimension_numbers<[1], [0], [0], [1], [0, 0, 1, 1], [], []>} : vector<8x16xf32>, vector<16x32xf32>, vector<8x32xf32> -> vector<8x32xf32>
    %c0_9 = arith.constant 0 : index
    %c0_10 = arith.constant 0 : index
    %23 = vector.load %arg3[%c0_9, %c0_10] : memref<1x32xf32, #tpu.memory_space<vmem>>, vector<1x32xf32>
    %24 = vector.broadcast %23 : vector<1x32xf32> to vector<8x32xf32>
    %25 = arith.addf %22, %24 : vector<8x32xf32>
    %cst_11 = arith.constant 0.000000e+00 : f32
    %26 = vector.broadcast %cst_11 : f32 to vector<8x32xf32>
    %27 = arith.maximumf %25, %26 : vector<8x32xf32>
    %cst_12 = arith.constant dense<0.000000e+00> : vector<8xf32>
    %28 = vector.multi_reduction <add>, %27, %cst_12 [1] : vector<8x32xf32> to vector<8xf32>
    %29 = vector.shape_cast %28 : vector<8xf32> to vector<8x1xf32>
    %30 = arith.mulf %27, %27 : vector<8x32xf32>
    %cst_13 = arith.constant dense<0.000000e+00> : vector<8xf32>
    %31 = vector.multi_reduction <add>, %30, %cst_13 [1] : vector<8x32xf32> to vector<8xf32>
    %32 = vector.shape_cast %31 : vector<8xf32> to vector<8x1xf32>
    %cst_14 = arith.constant 3.125000e-02 : f32
    %33 = vector.broadcast %cst_14 : f32 to vector<8x1xf32>
    %34 = arith.mulf %29, %33 : vector<8x1xf32>
    %cst_15 = arith.constant 3.125000e-02 : f32
    %35 = vector.broadcast %cst_15 : f32 to vector<8x1xf32>
    %36 = arith.mulf %32, %35 : vector<8x1xf32>
    %37 = arith.mulf %34, %34 : vector<8x1xf32>
    %38 = arith.subf %36, %37 : vector<8x1xf32>
    %cst_16 = arith.constant 0.000000e+00 : f32
    %39 = vector.broadcast %cst_16 : f32 to vector<8x1xf32>
    %40 = arith.maximumf %38, %39 : vector<8x1xf32>
    %41 = vector.broadcast %34 : vector<8x1xf32> to vector<8x32xf32>
    %42 = arith.subf %27, %41 : vector<8x32xf32>
    %cst_17 = arith.constant 9.99999974E-6 : f32
    %43 = vector.broadcast %cst_17 : f32 to vector<8x1xf32>
    %44 = arith.addf %40, %43 : vector<8x1xf32>
    %45 = math.rsqrt %44 : vector<8x1xf32>
    %46 = vector.broadcast %45 : vector<8x1xf32> to vector<8x32xf32>
    %47 = arith.mulf %42, %46 : vector<8x32xf32>
    %c0_18 = arith.constant 0 : index
    %c0_19 = arith.constant 0 : index
    %48 = vector.load %arg4[%c0_18, %c0_19] : memref<32x32xf32, #tpu.memory_space<vmem>>, vector<32x32xf32>
    %cst_20 = arith.constant dense<0.000000e+00> : vector<8x32xf32>
    %49 = tpu.matmul %47, %48, %cst_20 {dimension_numbers = #tpu.dot_dimension_numbers<[1], [0], [0], [1], [0, 0, 1, 1], [], []>} : vector<8x32xf32>, vector<32x32xf32>, vector<8x32xf32> -> vector<8x32xf32>
    %c0_21 = arith.constant 0 : index
    %c0_22 = arith.constant 0 : index
    %50 = vector.load %arg5[%c0_21, %c0_22] : memref<1x32xf32, #tpu.memory_space<vmem>>, vector<1x32xf32>
    %51 = vector.broadcast %50 : vector<1x32xf32> to vector<8x32xf32>
    %52 = arith.addf %49, %51 : vector<8x32xf32>
    %cst_23 = arith.constant 0.000000e+00 : f32
    %53 = vector.broadcast %cst_23 : f32 to vector<8x32xf32>
    %54 = arith.maximumf %52, %53 : vector<8x32xf32>
    %cst_24 = arith.constant dense<0.000000e+00> : vector<8xf32>
    %55 = vector.multi_reduction <add>, %54, %cst_24 [1] : vector<8x32xf32> to vector<8xf32>
    %56 = vector.shape_cast %55 : vector<8xf32> to vector<8x1xf32>
    %57 = arith.mulf %54, %54 : vector<8x32xf32>
    %cst_25 = arith.constant dense<0.000000e+00> : vector<8xf32>
    %58 = vector.multi_reduction <add>, %57, %cst_25 [1] : vector<8x32xf32> to vector<8xf32>
    %59 = vector.shape_cast %58 : vector<8xf32> to vector<8x1xf32>
    %cst_26 = arith.constant 3.125000e-02 : f32
    %60 = vector.broadcast %cst_26 : f32 to vector<8x1xf32>
    %61 = arith.mulf %56, %60 : vector<8x1xf32>
    %cst_27 = arith.constant 3.125000e-02 : f32
    %62 = vector.broadcast %cst_27 : f32 to vector<8x1xf32>
    %63 = arith.mulf %59, %62 : vector<8x1xf32>
    %64 = arith.mulf %61, %61 : vector<8x1xf32>
    %65 = arith.subf %63, %64 : vector<8x1xf32>
    %cst_28 = arith.constant 0.000000e+00 : f32
    %66 = vector.broadcast %cst_28 : f32 to vector<8x1xf32>
    %67 = arith.maximumf %65, %66 : vector<8x1xf32>
    %68 = vector.broadcast %61 : vector<8x1xf32> to vector<8x32xf32>
    %69 = arith.subf %54, %68 : vector<8x32xf32>
    %cst_29 = arith.constant 9.99999974E-6 : f32
    %70 = vector.broadcast %cst_29 : f32 to vector<8x1xf32>
    %71 = arith.addf %67, %70 : vector<8x1xf32>
    %72 = math.rsqrt %71 : vector<8x1xf32>
    %73 = vector.broadcast %72 : vector<8x1xf32> to vector<8x32xf32>
    %74 = arith.mulf %69, %73 : vector<8x32xf32>
    %c0_30 = arith.constant 0 : index
    %c0_31 = arith.constant 0 : index
    %75 = vector.load %arg6[%c0_30, %c0_31] : memref<32x128xf32, #tpu.memory_space<vmem>>, vector<32x128xf32>
    %cst_32 = arith.constant dense<0.000000e+00> : vector<8x128xf32>
    %76 = tpu.matmul %74, %75, %cst_32 {dimension_numbers = #tpu.dot_dimension_numbers<[1], [0], [0], [1], [0, 0, 1, 1], [], []>} : vector<8x32xf32>, vector<32x128xf32>, vector<8x128xf32> -> vector<8x128xf32>
    %c0_33 = arith.constant 0 : index
    %c0_34 = arith.constant 0 : index
    %77 = vector.load %arg7[%c0_33, %c0_34] : memref<1x128xf32, #tpu.memory_space<vmem>>, vector<1x128xf32>
    %78 = vector.broadcast %77 : vector<1x128xf32> to vector<8x128xf32>
    %79 = arith.addf %76, %78 : vector<8x128xf32>
    %c0_35 = arith.constant 0 : index
    %c0_36 = arith.constant 0 : index
    %80 = vector.load %arg8[%c0_35, %c0_36] : memref<8x128xf32, #tpu.memory_space<vmem>>, vector<8x128xf32>
    tpu.vector_store %arg8[%c0_35, %c0_36], %79 {strides = array<i32>} : memref<8x128xf32, #tpu.memory_space<vmem>>, vector<8x128xf32>,
    return
  }
  func.func @transform_0(%arg0: i32) -> (i32, i32) {
    %c0_i32 = arith.constant 0 : i32
    %c0_i32_0 = arith.constant 0 : i32
    return %arg0, %c0_i32 : i32, i32
  }
  func.func @transform_1(%arg0: i32) -> (i32, i32) {
    %c0_i32 = arith.constant 0 : i32
    %c0_i32_0 = arith.constant 0 : i32
    %c0_i32_1 = arith.constant 0 : i32
    return %c0_i32, %c0_i32_0 : i32, i32
  }
  func.func @transform_2(%arg0: i32) -> (i32, i32) {
    %c0_i32 = arith.constant 0 : i32
    %c0_i32_0 = arith.constant 0 : i32
    %c0_i32_1 = arith.constant 0 : i32
    return %c0_i32, %c0_i32_0 : i32, i32
  }
  func.func @transform_3(%arg0: i32) -> (i32, i32) {
    %c0_i32 = arith.constant 0 : i32
    %c0_i32_0 = arith.constant 0 : i32
    %c0_i32_1 = arith.constant 0 : i32
    return %c0_i32, %c0_i32_0 : i32, i32
  }
  func.func @transform_4(%arg0: i32) -> (i32, i32) {
    %c0_i32 = arith.constant 0 : i32
    %c0_i32_0 = arith.constant 0 : i32
    %c0_i32_1 = arith.constant 0 : i32
    return %c0_i32, %c0_i32_0 : i32, i32
  }
  func.func @transform_5(%arg0: i32) -> (i32, i32) {
    %c0_i32 = arith.constant 0 : i32
    %c0_i32_0 = arith.constant 0 : i32
    %c0_i32_1 = arith.constant 0 : i32
    return %c0_i32, %c0_i32_0 : i32, i32
  }
  func.func @transform_6(%arg0: i32) -> (i32, i32) {
    %c0_i32 = arith.constant 0 : i32
    %c0_i32_0 = arith.constant 0 : i32
    %c0_i32_1 = arith.constant 0 : i32
    return %c0_i32, %c0_i32_0 : i32, i32
  }
  func.func @transform_7(%arg0: i32) -> (i32, i32) {
    %c0_i32 = arith.constant 0 : i32
    %c0_i32_0 = arith.constant 0 : i32
    return %arg0, %c0_i32 : i32, i32
  }
}

</mosaic_0001>

<bundles_post_ra>
// kernel: tpu_custom_call.1
= control target key start
LH: loop header
LB: loop body
LE: loop exit
PB: predicated region body
PF: predicated region fallthrough
CT: control target
= control target key end

     0   :  { %12 = vsyncpa [#allocation3], 0  ;;  %s679_s0 = inlined_call_operand.hbm [shape: f32[8,16], index: 0, kind: input, shape index: {}]   ;;  %s680_s1 = inlined_call_operand.hbm [shape: f32[16,32], index: 1, kind: input, shape index: {}]   ;;  %s681_s2 = inlined_call_operand.vmem [shape: f32[1,32], index: 2, kind: input, shape index: {}]   ;;  %s682_s3 = inlined_call_operand.hbm [shape: f32[32,32], index: 3, kind: input, shape index: {}]   ;;  %s683_s4 = inlined_call_operand.vmem [shape: f32[1,32], index: 4, kind: input, shape index: {}]   ;;  %s684_s5 = inlined_call_operand.hbm [shape: f32[32,128], index: 5, kind: input, shape index: {}]   ;;  %s685_s6 = inlined_call_operand.vmem [shape: f32[1,128], index: 6, kind: input, shape index: {}]   ;;  %s686_s7 = inlined_call_operand.hbm [shape: f32[8,128], index: 7, kind: output, shape index: {}]  }
   0x1   :  { %13 = vsyncpa [#allocation6], 0 }
   0x2   :  { %14 = vsyncpa [#allocation9], 0 }
   0x3   :  { %15 = vsyncpa [#allocation4], 0  ;;  %s572_s24 = smov [#allocation5]  }
   0x4   :  { %s31_s25 = sshll.u32 %s572_s24, 4  ;;  %s32_s25 = int_to_ptr.vmem [resolvable:$true] %s31_s25 }
   0x5   :  { %s472_s26 = scalar_lea.vmem %s32_s25, 256  ;;  %p477_p1 = scmp.lt.s32.totalorder %s32_s25, %s32_s25 }
   0x6   :  { %p473_p0 = scmp.ne.s32.totalorder %s32_s25, %s472_s26  ;;  %p478_p2 = scmp.lt.s32.totalorder %s472_s26, %s472_s26 }
   0x8   :  { %p479_p3 = por %p478_p2, %p477_p1 }
   0xa   :  { %p480_p4 = pnand %p479_p3, %p473_p0 }
   0xc   :  { %483 = shalt.err (!%p480_p4)
}
   0xd   :  { %s573_s27 = smov 128   ;;  %s574_s28 = smov 8  }
   0xe   :  { %37 = dma.hbm_to_vmem [thread:$0]  %s680_s1, 256, %s32_s25, [#allocation6], %s573_s27, %s573_s27, %s574_s28  }
   0xf   :  { %s575_s8 = smov [#allocation2]   ;;  %s576_s10 = smov [#allocation7]  }
  0x10   :  { %s22_s9 = sshll.u32 %s575_s8, 4  ;;  %s45_s11 = sshll.u32 %s576_s10, 4  ;;  %s23_s9 = int_to_ptr.vmem [resolvable:$true] %s22_s9  ;;  %s46_s11 = int_to_ptr.vmem [resolvable:$true] %s45_s11 }
  0x11   :  { %s492_s12 = scalar_lea.vmem %s23_s9, 128  ;;  %p497_p6 = scmp.lt.s32.totalorder %s23_s9, %s23_s9 }
  0x12   :  { %p493_p5 = scmp.ne.s32.totalorder %s23_s9, %s492_s12  ;;  %p498_p7 = scmp.lt.s32.totalorder %s492_s12, %s492_s12 }
  0x14   :  { %p499_p8 = por %p498_p7, %p497_p6 }
  0x16   :  { %p500_p9 = pnand %p499_p8, %p493_p5 }
  0x18   :  { %503 = shalt.err (!%p500_p9)
}
  0x19   :  { %25 = dma.hbm_to_vmem [thread:$0]  %s679_s0, 128, %s23_s9, [#allocation3]  }
  0x1a   :  { %s512_s15 = scalar_lea.vmem %s46_s11, 512  ;;  %p517_p11 = scmp.lt.s32.totalorder %s46_s11, %s46_s11 }
  0x1b   :  { %p513_p10 = scmp.ne.s32.totalorder %s46_s11, %s512_s15  ;;  %p518_p12 = scmp.lt.s32.totalorder %s512_s15, %s512_s15 }
  0x1d   :  { %p519_p13 = por %p518_p12, %p517_p11 }
  0x1f   :  { %p520_p0 = pnand %p519_p13, %p513_p10 }
  0x21   :  { %523 = shalt.err (!%p520_p0)
}
  0x22   :  { %51 = dma.hbm_to_vmem [thread:$0]  %s682_s3, 512, %s46_s11, [#allocation6], %s573_s27, %s573_s27, %s574_s28  }
  0x23   :  { %s577_s17 = smov [#allocation8]  }
  0x24   :  { %s59_s18 = sshll.u32 %s577_s17, 4  ;;  %s60_s18 = int_to_ptr.vmem [resolvable:$true] %s59_s18 }
  0x25   :  { %s532_s19 = scalar_lea.vmem %s60_s18, 512  ;;  %p537_p2 = scmp.lt.s32.totalorder %s60_s18, %s60_s18 }
  0x26   :  { %p533_p1 = scmp.ne.s32.totalorder %s60_s18, %s532_s19  ;;  %p538_p3 = scmp.lt.s32.totalorder %s532_s19, %s532_s19 }
  0x28   :  { %p539_p4 = por %p538_p3, %p537_p2 }
  0x2a   :  { %p540_p5 = pnand %p539_p4, %p533_p1 }
  0x2c   :  { %543 = shalt.err (!%p540_p5)
}
  0x2d   :  { %65 = dma.hbm_to_vmem [thread:$0]  %s684_s5, 512, %s60_s18, [#allocation9], %s573_s27, %s573_s27, %s574_s28  }
  0x2e   :  { %564 = dma.done.wait [#allocation3], 128  }
  0x2f   :  { %565 = vsyncadd [#allocation3], 4294967168 }
  0x30   :  { %566 = dma.done.wait [#allocation6], 768  }
  0x31   :  { %567 = vsyncadd [#allocation6], 4294966528 }
  0x32   :  { %568 = dma.done.wait [#allocation9], 512  }
  0x33   :  { %569 = vsyncadd [#allocation9], 4294966784  ;;  %vm81_vm0 = vcmask 130048   ;;  %v80_v0 = vld [vmem:[#allocation2] sm:$0xff]  ;;  %v99_v4 = vld [vmem:[#allocation5 + $0x8] sm:$0xff]  ;;  %v578_v5 = vmov 0.0  }
  0x34   :  { %v82_v1 = vsel %vm81_vm0, %v80_v0, 0.0  ;;  %v85_v2 = vmul.f32 %v80_v0, %v80_v0  ;;  %420 = vmatprep.subr.mxu0 %v578_v5  ;;  %v98_v6 = vld [vmem:[#allocation5] sm:$0xff]  ;;  %vm579_vm1 = vmmov 0   ;;  %427 = vmatprep.subr.mxu1 %v578_v5  ;;  %v401_v18 = vld [vmem:[%s681_s2] ss:$0 sm:$0xff]  ;;  %vm181_vm2 = vcmask 261120  }
  0x35   :  { %83 = vadd.xlane.f32.xlu0 %v82_v1  ;;  %424 = vmatprep.mubr.msk.f32.mxu0 %vm579_vm1, %v578_v5  ;;  %v201_v26 = vld [vmem:[#allocation7 + $0x18] sm:$0xff]  ;;  %v200_v27 = vld [vmem:[#allocation7 + $0x10] sm:$0xff]  ;;  %v199_v28 = vld [vmem:[#allocation7 + $0x8] sm:$0xff]  ;;  %s580_s23 = smov [#allocation10]  }
  0x36   :  { %v86_v3 = vsel %vm81_vm0, %v85_v2, 0.0  ;;  %421 = vmatpush3.msra.mxu0 %v99_v4  ;;  %435 = vmatprep.mubr.msk.f32.mxu1 %vm579_vm1, %v578_v5  ;;  %v198_v29 = vld [vmem:[#allocation7] sm:$0xff]  ;;  %v403_v41 = vld [vmem:[%s683_s4] ss:$0 sm:$0xff]  ;;  %v302_v49 = vld [vmem:[#allocation8 + $0x18] sm:$0xff]  ;;  %s390_s24 = sshll.u32 %s580_s23, 4  ;;  %s391_s24 = int_to_ptr.vmem [resolvable:$true] %s390_s24 }
  0x37   :  { %422 = vmatprep.subr.mxu0 %v578_v5  ;;  %428 = vmatpush3.msra.mxu1 %v201_v26  ;;  %v301_v50 = vld [vmem:[#allocation8 + $0x10] sm:$0xff]  ;;  %v300_v51 = vld [vmem:[#allocation8 + $0x8] sm:$0xff]  ;;  %v299_v52 = vld [vmem:[#allocation8] sm:$0xff]  ;;  %s544_s25 = scalar_lea.vmem %s391_s24, 128  ;;  %p549_p7 = scmp.lt.s32.totalorder %s391_s24, %s391_s24 }
  0x38   :  { %423 = vmatpush3.msra.mxu0 %v98_v6  ;;  %429 = vmatprep.subr.mxu1 %v578_v5  ;;  %p545_p6 = scmp.ne.s32.totalorder %s391_s24, %s544_s25  ;;  %p550_p8 = scmp.lt.s32.totalorder %s544_s25, %s544_s25 }
  0x39   :  { %87 = vadd.xlane.f32.xlu0 %v86_v3  ;;  %438 = vmatprep.subr.mxu0 %v578_v5 }
  0x3a   :  { %430 = vmatpush3.msra.mxu1 %v200_v27  ;;  %p551_p9 = por %p550_p8, %p549_p7 }
  0x3b   :  { %431 = vmatprep.subr.mxu1 %v578_v5 }
  0x3c   :  { %432 = vmatpush3.msra.mxu1 %v199_v28  ;;  %p552_p10 = pnand %p551_p9, %p545_p6 }
  0x3d   :  { %433 = vmatprep.subr.mxu1 %v578_v5 }
  0x3e   :  { %434 = vmatpush3.msra.mxu1 %v198_v29 }
  0xbe   :  { %v84_v7 = vpop.xlane.xlu0 %83 }
  0xbf   :  { %v89_v8 = vmul.f32 0.0625, %v84_v7 }
  0xc1   :  { %v91_v10 = vmul.f32 %v89_v8, %v89_v8  ;;  %v94_v15 = vsub.f32 %v80_v0, %v89_v8  ;;  %v405_v0 = vld [vmem:[%s685_s6] ss:$0 sm:$0xff] }
  0xc2   :  { %v88_v9 = vpop.xlane.xlu0 %87 }
  0xc3   :  { %v90_v11 = vmul.f32 0.0625, %v88_v9 }
  0xc5   :  { %v92_v12 = vsub.f32 %v90_v11, %v91_v10 }
  0xc7   :  { %v93_v13 = vmax.f32 %v92_v12, 0.0 }
  0xc9   :  { %v95_v14 = vadd.f32 1e-05, %v93_v13 }
  0xcb   :  { %458 = vrsqrt.f32 %v95_v14 }
  0xd8   :  { %v459_v16 = vpop.eup %458 }
  0xd9   :  { %v97_v17 = vmul.f32 %v459_v16, %v94_v15 }
  0xdb   :  { %425 = vmatmul.mubr.msk.f32.vlgmr.msra.gmra.mxu0 %vm81_vm0, %v97_v17 }
  0xdc   :  { %446 = vmatprep.mubr.msk.f32.mxu0 %vm579_vm1, %v578_v5  ;;  %439 = vmatpush3.msra.mxu0 %v302_v49 }
  0xdd   :  { %440 = vmatprep.subr.mxu0 %v578_v5 }
  0xde   :  { %441 = vmatpush3.msra.mxu0 %v301_v50 }
  0xdf   :  { %442 = vmatprep.subr.mxu0 %v578_v5 }
  0xe0   :  { %443 = vmatpush3.msra.mxu0 %v300_v51 }
  0xe1   :  { %444 = vmatprep.subr.mxu0 %v578_v5 }
  0xe2   :  { %445 = vmatpush3.msra.mxu0 %v299_v52 }
 0x19b   :  { %v176_v19 = vpop.f32.mrf.mxu0 }
 0x19c   :  { %v177_v20 = vadd.f32 %v401_v18, %v176_v19 }
 0x19d   :  { %v426_v21 = vpop.f32.mrf.mxu0 }
 0x19e   :  { %v180_v22 = vmax.f32 %v177_v20, 0.0 }
 0x1a0   :  { %v182_v23 = vsel %vm181_vm2, %v180_v22, 0.0  ;;  %v185_v24 = vmul.f32 %v180_v22, %v180_v22 }
 0x1a1   :  { %183 = vadd.xlane.f32.xlu1 %v182_v23 }
 0x1a2   :  { %v186_v25 = vsel %vm181_vm2, %v185_v24, 0.0 }
 0x1a5   :  { %187 = vadd.xlane.f32.xlu1 %v186_v25 }
 0x22a   :  { %v184_v30 = vpop.xlane.xlu1 %183 }
 0x22b   :  { %v189_v31 = vmul.f32 0.03125, %v184_v30 }
 0x22d   :  { %v191_v33 = vmul.f32 %v189_v31, %v189_v31  ;;  %v194_v38 = vsub.f32 %v180_v22, %v189_v31 }
 0x22e   :  { %v188_v32 = vpop.xlane.xlu1 %187 }
 0x22f   :  { %v190_v34 = vmul.f32 0.03125, %v188_v32 }
 0x231   :  { %v192_v35 = vsub.f32 %v190_v34, %v191_v33 }
 0x233   :  { %v193_v36 = vmax.f32 %v192_v35, 0.0 }
 0x235   :  { %v195_v37 = vadd.f32 1e-05, %v193_v36 }
 0x237   :  { %460 = vrsqrt.f32 %v195_v37 }
 0x244   :  { %v461_v39 = vpop.eup %460 }
 0x245   :  { %v197_v40 = vmul.f32 %v461_v39, %v194_v38 }
 0x247   :  { %436 = vmatmul.mubr.msk.f32.vlgmr.msra.gmra.mxu1 %vm181_vm2, %v197_v40 }
 0x307   :  { %v278_v42 = vpop.f32.mrf.mxu1 }
 0x308   :  { %v279_v43 = vadd.f32 %v403_v41, %v278_v42 }
 0x309   :  { %v437_v44 = vpop.f32.mrf.mxu1 }
 0x30a   :  { %v282_v45 = vmax.f32 %v279_v43, 0.0 }
 0x30c   :  { %v283_v46 = vsel %vm181_vm2, %v282_v45, 0.0  ;;  %v286_v47 = vmul.f32 %v282_v45, %v282_v45 }
 0x30d   :  { %284 = vadd.xlane.f32.xlu0 %v283_v46 }
 0x30e   :  { %v287_v48 = vsel %vm181_vm2, %v286_v47, 0.0 }
 0x30f   :  { %288 = vadd.xlane.f32.xlu1 %v287_v48 }
 0x396   :  { %v285_v53 = vpop.xlane.xlu0 %284 }
 0x397   :  { %v290_v54 = vmul.f32 0.03125, %v285_v53 }
 0x398   :  { %v289_v55 = vpop.xlane.xlu1 %288 }
 0x399   :  { %v292_v56 = vmul.f32 %v290_v54, %v290_v54  ;;  %v291_v57 = vmul.f32 0.03125, %v289_v55  ;;  %v295_v61 = vsub.f32 %v282_v45, %v290_v54 }
 0x39b   :  { %v293_v58 = vsub.f32 %v291_v57, %v292_v56 }
 0x39d   :  { %v294_v59 = vmax.f32 %v293_v58, 0.0 }
 0x39f   :  { %v296_v60 = vadd.f32 1e-05, %v294_v59 }
 0x3a1   :  { %462 = vrsqrt.f32 %v296_v60 }
 0x3ae   :  { %v463_v62 = vpop.eup %462 }
 0x3af   :  { %v298_v63 = vmul.f32 %v463_v62, %v295_v61 }
 0x3b1   :  { %447 = vmatmul.mubr.msk.f32.vlgmr.msra.gmra.mxu0 %vm181_vm2, %v298_v63 }
 0x471   :  { %v379_v1 = vpop.f32.mrf.mxu0 }
 0x472   :  { %v380_v2 = vadd.f32 %v405_v0, %v379_v1 }
 0x473   :  { %v448_v3 = vpop.f32.mrf.mxu0 }
 0x474   :  { %383 = vst [vmem:[#allocation10] sm:$0xff] %v380_v2 }
 0x475   :  { %555 = shalt.err (!%p552_p10)
}
 0x476   :  { %393 = dma.vmem_to_hbm [thread:$0]  %s391_s24, 128, %s686_s7, [#allocation4]  }
 0x477   :  { %570 = dma.done.wait [#allocation4], 128  }
 0x478   :  { %571 = vsyncadd [#allocation4], 4294967168 }
 0x479   :  { %397 = vsyncpa [#allocation3], 1 }
 0x47a   :  { %398 = vsyncpa [#allocation6], 1 }
 0x47b   :  { %399 = vsyncpa [#allocation9], 1 }
 0x47c   :  { %400 = vsyncpa [#allocation4], 1 }

</bundles_post_ra>
